<compile_context>
chip_gen: v7x
topology: tpu7x:2x2x1
jax: 0.10.0
libtpu: 0.0.40
codegen_flags: <defaults>
</compile_context>

<pallas_src>
import functools
import math

import jax
import jax.numpy as jnp
from jax.experimental import pallas as pl
from jax.experimental.pallas import tpu as pltpu

# Deterministic "module parameters" (CustomLoss.__init__ args / WeightedDCTDis defaults).
WEIGHT1 = 1.0
WEIGHT2 = 0.5
EPSILON = 0.001  # WeightedDCTDis epsilon (weight_type='log')

_LANE = 128


def _custom_loss_kernel(adv_df_ref, ori_df_ref, adv_dct_ref, ori_dct_ref, wm_ref,
                        out_ref, acc_ref, *, w1n):
    step = pl.program_id(1)

    @pl.when(step == 0)
    def _init():
        acc_ref[...] = jnp.zeros_like(acc_ref)

    # Streaming body: pure elementwise VPU work on f32 (handles bf16 inputs).
    df_diff = adv_df_ref[...].astype(jnp.float32) - ori_df_ref[...].astype(jnp.float32)
    dct_diff = ori_dct_ref[...].astype(jnp.float32) - adv_dct_ref[...].astype(jnp.float32)
    # Merged contribution: weight1/n_df * (diff^2)  -  weight2*wm * |dct_diff|.
    # (wm_ref is (1, cols): cheap sublane broadcast; it already carries weight2.)
    contrib = jnp.float32(w1n) * (df_diff * df_diff) - wm_ref[...] * jnp.abs(dct_diff)

    # Sublane-reduce the tile to (8, cols) before accumulating so the running
    # accumulator is tiny (no per-vreg accumulator load/store).
    tr = contrib.shape[0]
    if tr == 8:
        acc_ref[...] += contrib
    else:
        acc_ref[...] += jnp.sum(contrib.reshape(tr // 8, 8, contrib.shape[1]), axis=0)

    # Epilogue: single small cross-lane reduction, per-split partial result.
    @pl.when(step == pl.num_programs(1) - 1)
    def _finalize():
        total = jnp.sum(acc_ref[...])
        out_ref[...] = jnp.full(out_ref.shape, total, dtype=jnp.float32)


def _tensorcores_per_chip():
    # v7x has 2 TensorCores per chip; v5e/v6e have 1.
    try:
        kind = jax.devices()[0].device_kind.lower()
    except Exception:
        return 1
    return 2 if "v7" in kind else 1


def _physical_vmem_bytes():
    try:
        return int(pltpu.get_tpu_info().vmem_capacity_bytes)
    except Exception:
        return 64 << 20  # conservative (v7x per-TC VMEM)


def custom_loss(adv_df, ori_df, adv_dct, ori_dct, qt,
                weight1=WEIGHT1, weight2=WEIGHT2, epsilon=EPSILON):
    assert adv_df.shape == ori_df.shape == adv_dct.shape == ori_dct.shape, (
        "fused kernel assumes matching feature / DCT tensor shapes")

    n_df = 1
    for d in adv_df.shape:
        n_df *= d
    H, W = qt.shape[-2], qt.shape[-1]
    cols = H * W
    rows = n_df // cols

    # Weight matrix: tiny (H*W), computed once in plain JAX (hoisted out of the
    # streamed loop), pre-scaled by weight2 (merged-accumulator form), and
    # passed lane-dense as (1, cols).
    qt_f = qt.astype(jnp.float32)
    wm = 1.0 / jnp.log(qt_f + jnp.float32(epsilon))
    wm_w2 = (jnp.float32(weight2) * (wm / jnp.max(wm))).reshape(1, cols)

    # Lane-dense 2-D layout: (B*C, H*W).
    streams = [t.reshape(rows, cols) for t in (adv_df, ori_df, adv_dct, ori_dct)]

    # If H*W is not a multiple of 128 (e.g. 8x8 DCT -> 64), fold k DCT blocks
    # into the lane axis so every vector op / DMA is unmasked and lane-dense.
    if cols % _LANE != 0:
        k = _LANE // math.gcd(cols, _LANE)
        pad_rows = (-rows) % k
        if pad_rows:
            # Zero rows contribute 0 to both sums; MSE divides by true n_df.
            streams = [jnp.pad(t, ((0, pad_rows), (0, 0))) for t in streams]
        rows = (rows + pad_rows) // k
        streams = [t.reshape(rows, k * cols) for t in streams]
        wm_w2 = jnp.tile(wm_w2, (1, k))
        cols = k * cols

    itemsize = max(jnp.dtype(t.dtype).itemsize for t in streams)
    sub = max(8, 32 // itemsize)  # sublane granularity (8 for f32, 16 for bf16)

    # Tile sizing: ~1M elements (~4 MiB f32) per stream tile so the fixed
    # ~0.35 us per-step overhead stays a few percent of wall even on v7x's
    # ~3.2 TB/s HBM.  With the shrunk (8, cols) accumulator, 4 streams x 2
    # buffers x 4 MiB (f32) = 32 MiB, comfortably under 48 MiB on every gen.
    target_elems = 1024 * 1024
    tile_rows = (target_elems // max(cols, 1)) // sub * sub
    rows_ceil = -(-rows // sub) * sub
    tile_rows = max(sub, min(tile_rows, rows_ceil))
    # TODO(synk): for pathological cols (H*W*k > ~8M) the minimum 8-row tile
    # exceeds the byte budget; a column-tiled grid axis would be needed there.

    steps_total = -(-rows // tile_rows)

    # Split the stream across TensorCores only on multi-TC chips (v7x); on
    # v5e/v6e a "split" is just a serial loop with extra init/epilogue work.
    cores = _tensorcores_per_chip()
    num_splits = cores if (cores > 1 and steps_total >= 2) else 1
    steps_per_split = -(-steps_total // num_splits)
    rows_padded = num_splits * steps_per_split * tile_rows

    if rows_padded != rows:
        # Zero padding contributes 0 to both sums; MSE divides by the true count.
        streams = [jnp.pad(t, ((0, rows_padded - rows), (0, 0))) for t in streams]

    kernel = functools.partial(
        _custom_loss_kernel, w1n=float(weight1) / float(n_df))

    stream_spec = pl.BlockSpec(
        (tile_rows, cols), lambda p, i: (p * steps_per_split + i, 0))
    wm_spec = pl.BlockSpec((1, cols), lambda p, i: (0, 0))

    # VMEM budget: 4 streams x 2 buffers + (8, cols) accumulator + wm + slack,
    # clamped below physical VMEM (64 MiB/TC on v7x, 128 MiB on v5e/v6e).
    tile_in_bytes = tile_rows * cols * itemsize
    acc_bytes = 8 * cols * 4
    vmem_needed = 4 * 2 * tile_in_bytes + acc_bytes + 2 * cols * 4 + (2 << 20)
    phys_vmem = _physical_vmem_bytes()
    vmem_cap = max(32 << 20, phys_vmem - (16 << 20))
    vmem_limit = int(min(vmem_cap, max(16 << 20, vmem_needed)))

    n_stream_elems = rows_padded * cols
    cost = pl.CostEstimate(
        flops=8 * n_stream_elems,
        transcendentals=0,
        bytes_accessed=4 * n_stream_elems * itemsize + cols * 4
                       + num_splits * 8 * 128 * 4)

    if num_splits > 1:
        dims = (getattr(pltpu, "CORE_PARALLEL", pltpu.PARALLEL), pltpu.ARBITRARY)
    else:
        dims = ("arbitrary", "arbitrary")

    out = pl.pallas_call(
        kernel,
        out_shape=jax.ShapeDtypeStruct((num_splits, 8, 128), jnp.float32),
        grid=(num_splits, steps_per_split),
        in_specs=[stream_spec] * 4 + [wm_spec],
        out_specs=pl.BlockSpec((1, 8, 128), lambda p, i: (p, 0, 0)),
        scratch_shapes=[pltpu.VMEM((8, cols), jnp.float32)],
        compiler_params=pltpu.CompilerParams(
            dimension_semantics=dims,
            vmem_limit_bytes=vmem_limit),
        cost_estimate=cost,
    )(*streams, wm_w2)

    # Per-split partials (each split wrote its value broadcast over its block).
    return jnp.sum(out[:, 0, 0])


def _reference(adv_df, ori_df, adv_dct, ori_dct, qt,
               weight1=WEIGHT1, weight2=WEIGHT2, epsilon=EPSILON):
    loss1 = jnp.mean((adv_df - ori_df) ** 2)
    wm = 1.0 / jnp.log(qt + epsilon)
    wm = wm / jnp.max(wm)
    loss2 = jnp.sum(wm * jnp.abs(ori_dct - adv_dct))
    return weight1 * loss1 - weight2 * loss2


if __name__ == "__main__":
    key = jax.random.PRNGKey(0)
    k1, k2, k3, k4, k5 = jax.random.split(key, 5)

    B, C, H, W = 2, 4, 16, 16
    adv_df = jax.random.normal(k1, (B, C, H, W), dtype=jnp.float32)
    ori_df = jax.random.normal(k2, (B, C, H, W), dtype=jnp.float32)
    adv_dct = jax.random.normal(k3, (B, C, H, W), dtype=jnp.float32)
    ori_dct = jax.random.normal(k4, (B, C, H, W), dtype=jnp.float32)
    # JPEG-style quantization table: strictly positive values > 1.
    qt = jax.random.uniform(k5, (H, W), dtype=jnp.float32, minval=2.0, maxval=100.0)

    result = jax.block_until_ready(
        custom_loss(adv_df, ori_df, adv_dct, ori_dct, qt))
    expected = jax.block_until_ready(
        _reference(adv_df, ori_df, adv_dct, ori_dct, qt))

    assert jnp.allclose(result, expected, rtol=1e-5, atol=1e-5), (result, expected)
    print("KERNEL_OK")
</pallas_src>

<mosaic_0001>
module attributes {stable_mosaic.version = 11 : i64} {
  func.func @_custom_loss_kernel(%arg0: i32, %arg1: i32, %arg2: memref<8x256xf32, #tpu.memory_space<vmem>>, %arg3: memref<8x256xf32, #tpu.memory_space<vmem>>, %arg4: memref<8x256xf32, #tpu.memory_space<vmem>>, %arg5: memref<8x256xf32, #tpu.memory_space<vmem>>, %arg6: memref<1x256xf32, #tpu.memory_space<vmem>>, %arg7: memref<1x8x128xf32, #tpu.memory_space<vmem>>, %arg8: memref<8x256xf32, #tpu.memory_space<vmem>>) attributes {dimension_semantics = [#tpu.dimension_semantics<arbitrary>, #tpu.dimension_semantics<arbitrary>], iteration_bounds = array<i64: 1, 1>, scalar_prefetch = 0 : i64, scratch_operands = 1 : i64, tpu.core_type = #tpu.core_type<tc>, window_params = [{transform_indices = @transform_0, window_bounds = array<i64: 8, 256>}, {transform_indices = @transform_1, window_bounds = array<i64: 8, 256>}, {transform_indices = @transform_2, window_bounds = array<i64: 8, 256>}, {transform_indices = @transform_3, window_bounds = array<i64: 8, 256>}, {pipeline_mode = #tpu.pipeline_mode<synchronous>, transform_indices = @transform_4, window_bounds = array<i64: 1, 256>}, {transform_indices = @transform_5, window_bounds = array<i64: 1, 8, 128>}]} {
    %c0_i32 = arith.constant 0 : i32
    %0 = arith.cmpi eq, %arg1, %c0_i32 : i32
    %1 = arith.extui %0 : i1 to i32
    %c0_i32_0 = arith.constant 0 : i32
    %2 = arith.cmpi ne, %1, %c0_i32_0 : i32
    scf.if %2 {
      %cst_16 = arith.constant 0.000000e+00 : f32
      %23 = vector.broadcast %cst_16 : f32 to vector<8x256xf32>
      %c0_17 = arith.constant 0 : index
      %c0_18 = arith.constant 0 : index
      %24 = vector.load %arg8[%c0_17, %c0_18] : memref<8x256xf32, #tpu.memory_space<vmem>>, vector<8x256xf32>
      tpu.vector_store %arg8[%c0_17, %c0_18], %23 {strides = array<i32>} : memref<8x256xf32, #tpu.memory_space<vmem>>, vector<8x256xf32>,
    } else {
    }
    %c0 = arith.constant 0 : index
    %c0_1 = arith.constant 0 : index
    %3 = vector.load %arg2[%c0, %c0_1] : memref<8x256xf32, #tpu.memory_space<vmem>>, vector<8x256xf32>
    %c0_2 = arith.constant 0 : index
    %c0_3 = arith.constant 0 : index
    %4 = vector.load %arg3[%c0_2, %c0_3] : memref<8x256xf32, #tpu.memory_space<vmem>>, vector<8x256xf32>
    %5 = arith.subf %3, %4 : vector<8x256xf32>
    %c0_4 = arith.constant 0 : index
    %c0_5 = arith.constant 0 : index
    %6 = vector.load %arg5[%c0_4, %c0_5] : memref<8x256xf32, #tpu.memory_space<vmem>>, vector<8x256xf32>
    %c0_6 = arith.constant 0 : index
    %c0_7 = arith.constant 0 : index
    %7 = vector.load %arg4[%c0_6, %c0_7] : memref<8x256xf32, #tpu.memory_space<vmem>>, vector<8x256xf32>
    %8 = arith.subf %6, %7 : vector<8x256xf32>
    %9 = arith.mulf %5, %5 : vector<8x256xf32>
    %cst = arith.constant 4.8828125E-4 : f32
    %10 = vector.broadcast %cst : f32 to vector<8x256xf32>
    %11 = arith.mulf %10, %9 : vector<8x256xf32>
    %c0_8 = arith.constant 0 : index
    %c0_9 = arith.constant 0 : index
    %12 = vector.load %arg6[%c0_8, %c0_9] : memref<1x256xf32, #tpu.memory_space<vmem>>, vector<1x256xf32>
    %13 = math.absf %8 : vector<8x256xf32>
    %14 = vector.broadcast %12 : vector<1x256xf32> to vector<8x256xf32>
    %15 = arith.mulf %14, %13 : vector<8x256xf32>
    %16 = arith.subf %11, %15 : vector<8x256xf32>
    %c0_10 = arith.constant 0 : index
    %c0_11 = arith.constant 0 : index
    %17 = vector.load %arg8[%c0_10, %c0_11] : memref<8x256xf32, #tpu.memory_space<vmem>>, vector<8x256xf32>
    %18 = arith.addf %17, %16 : vector<8x256xf32>
    %c0_12 = arith.constant 0 : index
    %c0_13 = arith.constant 0 : index
    %19 = vector.load %arg8[%c0_12, %c0_13] : memref<8x256xf32, #tpu.memory_space<vmem>>, vector<8x256xf32>
    tpu.vector_store %arg8[%c0_12, %c0_13], %18 {strides = array<i32>} : memref<8x256xf32, #tpu.memory_space<vmem>>, vector<8x256xf32>,
    %c0_i32_14 = arith.constant 0 : i32
    %20 = arith.cmpi eq, %arg1, %c0_i32_14 : i32
    %21 = arith.extui %20 : i1 to i32
    %c0_i32_15 = arith.constant 0 : i32
    %22 = arith.cmpi ne, %21, %c0_i32_15 : i32
    scf.if %22 {
      %c0_16 = arith.constant 0 : index
      %c0_17 = arith.constant 0 : index
      %23 = vector.load %arg8[%c0_16, %c0_17] : memref<8x256xf32, #tpu.memory_space<vmem>>, vector<8x256xf32>
      %24 = vector.shape_cast %23 : vector<8x256xf32> to vector<1x8x256xf32>
      %cst_18 = arith.constant dense<0.000000e+00> : vector<1xf32>
      %25 = vector.multi_reduction <add>, %24, %cst_18 [1, 2] : vector<1x8x256xf32> to vector<1xf32>
      %26 = vector.shape_cast %25 : vector<1xf32> to vector<1x1x1xf32>
      %27 = vector.extract %26[0, 0, 0] : f32 from vector<1x1x1xf32>
      %28 = vector.broadcast %27 : f32 to vector<1x8x128xf32>
      %c0_19 = arith.constant 0 : index
      %c0_20 = arith.constant 0 : index
      %c0_21 = arith.constant 0 : index
      %29 = vector.load %arg7[%c0_19, %c0_20, %c0_21] : memref<1x8x128xf32, #tpu.memory_space<vmem>>, vector<1x8x128xf32>
      tpu.vector_store %arg7[%c0_19, %c0_20, %c0_21], %28 {strides = array<i32>} : memref<1x8x128xf32, #tpu.memory_space<vmem>>, vector<1x8x128xf32>,
    } else {
    }
    return
  }
  func.func @transform_0(%arg0: i32, %arg1: i32) -> (i32, i32) {
    %c1_i32 = arith.constant 1 : i32
    %0 = arith.muli %arg0, %c1_i32 : i32
    %1 = arith.addi %0, %arg1 : i32
    %c0_i32 = arith.constant 0 : i32
    %c0_i32_0 = arith.constant 0 : i32
    return %1, %c0_i32 : i32, i32
  }
  func.func @transform_1(%arg0: i32, %arg1: i32) -> (i32, i32) {
    %c1_i32 = arith.constant 1 : i32
    %0 = arith.muli %arg0, %c1_i32 : i32
    %1 = arith.addi %0, %arg1 : i32
    %c0_i32 = arith.constant 0 : i32
    %c0_i32_0 = arith.constant 0 : i32
    return %1, %c0_i32 : i32, i32
  }
  func.func @transform_2(%arg0: i32, %arg1: i32) -> (i32, i32) {
    %c1_i32 = arith.constant 1 : i32
    %0 = arith.muli %arg0, %c1_i32 : i32
    %1 = arith.addi %0, %arg1 : i32
    %c0_i32 = arith.constant 0 : i32
    %c0_i32_0 = arith.constant 0 : i32
    return %1, %c0_i32 : i32, i32
  }
  func.func @transform_3(%arg0: i32, %arg1: i32) -> (i32, i32) {
    %c1_i32 = arith.constant 1 : i32
    %0 = arith.muli %arg0, %c1_i32 : i32
    %1 = arith.addi %0, %arg1 : i32
    %c0_i32 = arith.constant 0 : i32
    %c0_i32_0 = arith.constant 0 : i32
    return %1, %c0_i32 : i32, i32
  }
  func.func @transform_4(%arg0: i32, %arg1: i32) -> (i32, i32) {
    %c0_i32 = arith.constant 0 : i32
    %c0_i32_0 = arith.constant 0 : i32
    %c0_i32_1 = arith.constant 0 : i32
    return %c0_i32, %c0_i32_0 : i32, i32
  }
  func.func @transform_5(%arg0: i32, %arg1: i32) -> (i32, i32, i32) {
    %c0_i32 = arith.constant 0 : i32
    %c0_i32_0 = arith.constant 0 : i32
    %c0_i32_1 = arith.constant 0 : i32
    return %arg0, %c0_i32, %c0_i32_0 : i32, i32, i32
  }
}

</mosaic_0001>

<bundles_post_ra>
// kernel: tpu_custom_call.1
= control target key start
LH: loop header
LB: loop body
LE: loop exit
PB: predicated region body
PF: predicated region fallthrough
CT: control target
= control target key end

     0   :  { %10 = vsyncpa [#allocation4], 0  ;;  %s391_s0 = inlined_call_operand.hbm [shape: f32[8,256], index: 0, kind: input, shape index: {}]   ;;  %s392_s1 = inlined_call_operand.hbm [shape: f32[8,256], index: 1, kind: input, shape index: {}]   ;;  %s393_s2 = inlined_call_operand.hbm [shape: f32[8,256], index: 2, kind: input, shape index: {}]   ;;  %s394_s3 = inlined_call_operand.hbm [shape: f32[8,256], index: 3, kind: input, shape index: {}]   ;;  %s395_s4 = inlined_call_operand.vmem [shape: f32[1,256], index: 4, kind: input, shape index: {}]   ;;  %s396_s5 = inlined_call_operand.hbm [shape: f32[1,8,128], index: 5, kind: output, shape index: {}]  }
   0x1   :  { %11 = vsyncpa [#allocation7], 0 }
   0x2   :  { %12 = vsyncpa [#allocation10], 0 }
   0x3   :  { %13 = vsyncpa [#allocation5], 0  ;;  %s293_s18 = smov [#allocation6]   ;;  %s294_s20 = smov [#allocation3]  }
   0x4   :  { %s38_s19 = sshll.u32 %s293_s18, 4  ;;  %s24_s21 = sshll.u32 %s294_s20, 4  ;;  %s39_s19 = int_to_ptr.vmem [resolvable:$true] %s38_s19  ;;  %s25_s21 = int_to_ptr.vmem [resolvable:$true] %s24_s21 }
   0x5   :  { %s175_s24 = scalar_lea.hbm %s392_s1, 256 }
   0x6   :  { %p176_p0 = scmp.ne.s32.totalorder %s392_s1, %s175_s24  ;;  %p179_p1 = scmp.lt.u32.totalorder %s175_s24, %s392_s1 }
   0x8   :  { %p181_p2 = pnand %p179_p1, %p176_p0 }
   0xa   :  { %184 = shalt.err (!%p181_p2)
}
   0xb   :  { %s185_s29 = scalar_lea.vmem %s39_s19, 256  ;;  %p190_p4 = scmp.lt.s32.totalorder %s39_s19, %s39_s19 }
   0xc   :  { %p186_p3 = scmp.ne.s32.totalorder %s39_s19, %s185_s29  ;;  %p191_p5 = scmp.lt.s32.totalorder %s185_s29, %s185_s29 }
   0xe   :  { %p192_p6 = por %p191_p5, %p190_p4 }
  0x10   :  { %p193_p7 = pnand %p192_p6, %p186_p3 }
  0x12   :  { %196 = shalt.err (!%p193_p7)
}
  0x13   :  { %41 = dma.hbm_to_vmem [thread:$0]  %s392_s1, 256, %s39_s19, [#allocation7]  }
  0x14   :  { %s197_s9 = scalar_lea.hbm %s391_s0, 256 }
  0x15   :  { %p198_p8 = scmp.ne.s32.totalorder %s391_s0, %s197_s9  ;;  %p201_p9 = scmp.lt.u32.totalorder %s197_s9, %s391_s0 }
  0x17   :  { %p203_p10 = pnand %p201_p9, %p198_p8 }
  0x19   :  { %206 = shalt.err (!%p203_p10)
}
  0x1a   :  { %s207_s14 = scalar_lea.vmem %s25_s21, 256  ;;  %p212_p12 = scmp.lt.s32.totalorder %s25_s21, %s25_s21 }
  0x1b   :  { %p208_p11 = scmp.ne.s32.totalorder %s25_s21, %s207_s14  ;;  %p213_p13 = scmp.lt.s32.totalorder %s207_s14, %s207_s14 }
  0x1d   :  { %p214_p0 = por %p213_p13, %p212_p12 }
  0x1f   :  { %p215_p1 = pnand %p214_p0, %p208_p11 }
  0x21   :  { %218 = shalt.err (!%p215_p1)
}
  0x22   :  { %27 = dma.hbm_to_vmem [thread:$0]  %s391_s0, 256, %s25_s21, [#allocation4]  }
  0x23   :  { %s295_s16 = smov [#allocation8]   ;;  %s296_s18 = smov [#allocation9]  }
  0x24   :  { %s52_s17 = sshll.u32 %s295_s16, 4  ;;  %s66_s19 = sshll.u32 %s296_s18, 4  ;;  %s53_s17 = int_to_ptr.vmem [resolvable:$true] %s52_s17  ;;  %s67_s19 = int_to_ptr.vmem [resolvable:$true] %s66_s19 }
  0x25   :  { %s219_s23 = scalar_lea.hbm %s393_s2, 256 }
  0x26   :  { %p220_p2 = scmp.ne.s32.totalorder %s393_s2, %s219_s23  ;;  %p223_p3 = scmp.lt.u32.totalorder %s219_s23, %s393_s2 }
  0x28   :  { %p225_p4 = pnand %p223_p3, %p220_p2 }
  0x2a   :  { %228 = shalt.err (!%p225_p4)
}
  0x2b   :  { %s229_s0 = scalar_lea.vmem %s53_s17, 256  ;;  %p234_p6 = scmp.lt.s32.totalorder %s53_s17, %s53_s17 }
  0x2c   :  { %p230_p5 = scmp.ne.s32.totalorder %s53_s17, %s229_s0  ;;  %p235_p7 = scmp.lt.s32.totalorder %s229_s0, %s229_s0 }
  0x2e   :  { %p236_p8 = por %p235_p7, %p234_p6 }
  0x30   :  { %p237_p9 = pnand %p236_p8, %p230_p5 }
  0x32   :  { %240 = shalt.err (!%p237_p9)
}
  0x33   :  { %55 = dma.hbm_to_vmem [thread:$0]  %s393_s2, 256, %s53_s17, [#allocation7]  }
  0x34   :  { %s241_s6 = scalar_lea.hbm %s394_s3, 256 }
  0x35   :  { %p242_p10 = scmp.ne.s32.totalorder %s394_s3, %s241_s6  ;;  %p245_p11 = scmp.lt.u32.totalorder %s241_s6, %s394_s3 }
  0x37   :  { %p247_p12 = pnand %p245_p11, %p242_p10 }
  0x39   :  { %250 = shalt.err (!%p247_p12)
}
  0x3a   :  { %s251_s11 = scalar_lea.vmem %s67_s19, 256  ;;  %p256_p0 = scmp.lt.s32.totalorder %s67_s19, %s67_s19 }
  0x3b   :  { %p252_p13 = scmp.ne.s32.totalorder %s67_s19, %s251_s11  ;;  %p257_p1 = scmp.lt.s32.totalorder %s251_s11, %s251_s11 }
  0x3d   :  { %p258_p2 = por %p257_p1, %p256_p0 }
  0x3f   :  { %p259_p3 = pnand %p258_p2, %p252_p13 }
  0x41   :  { %262 = shalt.err (!%p259_p3)
}
  0x42   :  { %69 = dma.hbm_to_vmem [thread:$0]  %s394_s3, 256, %s67_s19, [#allocation10]  }
  0x43   :  { %285 = dma.done.wait [#allocation4], 256  }
  0x44   :  { %286 = vsyncadd [#allocation4], 4294967040 }
  0x45   :  { %287 = dma.done.wait [#allocation7], 512  }
  0x46   :  { %288 = vsyncadd [#allocation7], 4294966784 }
  0x47   :  { %289 = dma.done.wait [#allocation10], 256  }
  0x48   :  { %290 = vsyncadd [#allocation10], 4294967040  ;;  %v114_v0 = vlaneseq  ;;  %v94_v3 = vld [vmem:[#allocation3] sm:$0xff]  ;;  %v95_v4 = vld [vmem:[#allocation3 + $0x8] sm:$0xff] }
  0x49   :  { %v96_v5 = vld [vmem:[#allocation6] sm:$0xff]  ;;  %v97_v7 = vld [vmem:[#allocation6 + $0x8] sm:$0xff]  ;;  %v102_v12 = vld [vmem:[#allocation8] sm:$0xff] }
  0x4a   :  { %v115_v1 = vshrl.u32 %v114_v0, 7  ;;  %v98_v8 = vsub.f32 %v94_v3, %v96_v5  ;;  %v100_v9 = vld [vmem:[#allocation9] sm:$0xff]  ;;  %v101_v10 = vld [vmem:[#allocation9 + $0x8] sm:$0xff]  ;;  %v99_v11 = vsub.f32 %v95_v4, %v97_v7  ;;  %v103_v13 = vld [vmem:[#allocation8 + $0x8] sm:$0xff] }
  0x4b   :  { %v110_v14 = vld [vmem:[%s395_s4] sm:$0x3]  ;;  %v104_v15 = vsub.f32 %v100_v9, %v102_v12  ;;  %v105_v16 = vsub.f32 %v101_v10, %v103_v13  ;;  %s297_s4 = smov [#allocation11]  }
  0x4c   :  { %v116_v2 = vsub.s32 0, %v115_v1  ;;  %v120_v6 = vsub.s32 1, %v115_v1  ;;  %v106_v17 = vmul.f32 %v98_v8, %v98_v8  ;;  %v107_v19 = vmul.f32 %v99_v11, %v99_v11  ;;  %s157_s14 = sshll.u32 %s297_s4, 4  ;;  %s158_s14 = int_to_ptr.vmem [resolvable:$true] %s157_s14 }
  0x4d   :  { %v111_v22 = vand.u32 2147483647, %v104_v15  ;;  %v112_v23 = vand.u32 2147483647, %v105_v16  ;;  %s263_s15 = scalar_lea.vmem %s158_s14, 128  ;;  %p268_p5 = scmp.lt.s32.totalorder %s158_s14, %s158_s14 }
  0x4e   :  { %v117_v18 = vrot.slane %v110_v14, %v116_v2  ;;  %v121_v20 = vrot.slane %v110_v14, %v120_v6  ;;  %v108_v21 = vmul.f32 0.00048828125, %v106_v17  ;;  %v109_v24 = vmul.f32 0.00048828125, %v107_v19  ;;  %p264_p4 = scmp.ne.s32.totalorder %s158_s14, %s263_s15  ;;  %p269_p6 = scmp.lt.s32.totalorder %s263_s15, %s263_s15 }
  0x50   :  { %v124_v25 = vmul.f32 %v117_v18, %v111_v22  ;;  %v125_v26 = vmul.f32 %v121_v20, %v112_v23  ;;  %p270_p7 = por %p269_p6, %p268_p5 }
  0x52   :  { %v126_v27 = vsub.f32 %v108_v21, %v124_v25  ;;  %v127_v28 = vsub.f32 %v109_v24, %v125_v26  ;;  %p271_p8 = pnand %p270_p7, %p264_p4 }
  0x54   :  { %v139_v29 = vadd.f32 %v127_v28, %v126_v27 }
  0x56   :  { %140 = vadd.xlane.f32.xlu0 %v139_v29 }
  0xe3   :  { %v141_v30 = vpop.xlane.xlu0 %140 }
  0xe4   :  { %v142_v31 = vrot.slane %v141_v30, 4 }
  0xe6   :  { %v143_v32 = vadd.f32 %v142_v31, %v141_v30 }
  0xe8   :  { %v144_v33 = vrot.slane %v143_v32, 2 }
  0xea   :  { %v145_v34 = vadd.f32 %v144_v33, %v143_v32 }
  0xec   :  { %v146_v35 = vrot.slane %v145_v34, 1 }
  0xee   :  { %v147_v36 = vadd.f32 %v146_v35, %v145_v34 }
  0xf0   :  { %168 = vpush %v147_v36 }
 0x121   :  { %s169_s1 = spop %168 }
 0x122   :  { %v149_v37 = vstv %s169_s1 }
 0x123   :  { %150 = vst [vmem:[#allocation11] sm:$0xff] %v149_v37 }
 0x124   :  { %274 = shalt.err (!%p271_p8)
}
 0x125   :  { %s275_s18 = scalar_lea.hbm %s396_s5, 128 }
 0x126   :  { %p276_p9 = scmp.ne.s32.totalorder %s396_s5, %s275_s18  ;;  %p279_p10 = scmp.lt.u32.totalorder %s275_s18, %s396_s5 }
 0x128   :  { %p281_p11 = pnand %p279_p10, %p276_p9 }
 0x12a   :  { %284 = shalt.err (!%p281_p11)
}
 0x12b   :  { %160 = dma.vmem_to_hbm [thread:$0]  %s158_s14, 128, %s396_s5, [#allocation5]  }
 0x12c   :  { %291 = dma.done.wait [#allocation5], 128  }
 0x12d   :  { %292 = vsyncadd [#allocation5], 4294967168 }
 0x12e   :  { %164 = vsyncpa [#allocation4], 1 }
 0x12f   :  { %165 = vsyncpa [#allocation7], 1 }
 0x130   :  { %166 = vsyncpa [#allocation10], 1 }
 0x131   :  { %167 = vsyncpa [#allocation5], 1 }

</bundles_post_ra>
